<compile_context>
chip_gen: v6e
topology: v6e:2x2x1
jax: 0.10.0
libtpu: 0.0.40
codegen_flags: <defaults>
</compile_context>

<pallas_src>
import math

import jax
import jax.numpy as jnp
from jax import lax
from jax.experimental import pallas as pl
from jax.experimental.pallas import tpu as pltpu

_EPS = 1e-5  # PyTorch F.batch_norm default
_FAST_PATH_BYTES = 1 << 20  # below this, plain jnp beats pallas_call overhead


def _vbn_kernel(x_ref, scale_ref, shift_ref, o_ref):
    # y = x * scale + shift ; scale/shift are (1, tf) f32 rows broadcast over rows.
    x = x_ref[...].astype(jnp.float32)
    y = x * scale_ref[...] + shift_ref[...]
    o_ref[...] = y.astype(o_ref.dtype)


def _choose_pack(B, F):
    """Smallest k dividing B with (k*F) % 128 == 0 (lane-dense last dim)."""
    if F % 128 == 0:
        return 1
    k = 128 // math.gcd(F, 128)
    return k if B % k == 0 else 1


def _sublane_pack(dtype):
    """Sublane packing factor: 8 for 32-bit, 16 for bf16, 32 for 8-bit dtypes."""
    return max(8, 32 // jnp.dtype(dtype).itemsize)


def _tpu_budgets():
    """(target_block_bytes, vmem_limit_bytes), generation-gated, safe fallback."""
    vmem_cap = 64 << 20  # assume v7x (smallest VMEM) if the query fails
    try:
        info = pltpu.get_tpu_info()
        vmem_cap = int(getattr(info, "vmem_capacity_bytes", vmem_cap))
    except Exception:
        pass
    if vmem_cap >= (96 << 20):      # v5e / v6e: 128 MiB physical VMEM
        return 8 << 20, 64 << 20
    return 6 << 20, 48 << 20        # v7x: 64 MiB physical, 3.2 TB/s HBM


def _choose_tiles(rows, Fe, itemsize, sub, target_bytes):
    """Pick (tb, tf) so one block <= target_bytes, lane/sublane aligned."""
    row_bytes = max(Fe * itemsize, 1)
    rows_fit = max(1, target_bytes // row_bytes)
    if rows_fit >= sub or rows_fit >= rows:
        # Full feature extent per block; tile rows only.
        if rows_fit >= rows:
            return rows, Fe                      # single full-extent row block
        return (rows_fit // sub) * sub, Fe       # multiple of the sublane pack
    # Fe too wide for even `sub` rows: tile the feature axis in 128 multiples.
    tf = max(128, (target_bytes // (itemsize * sub)) // 128 * 128)
    tf = min(tf, Fe)
    return min(rows, sub), tf


def virtual_batch_norm_1d(x, mean, var, weight, bias, *, eps=_EPS,
                          force_pallas=False, donate_x=False):
    """x: (B, F); mean/var/weight/bias: (F,). Returns (B, F) in x.dtype."""
    assert x.ndim == 2, "expected 2D input (got {}D input)".format(x.ndim)
    B, F = x.shape
    itemsize = jnp.dtype(x.dtype).itemsize

    # ---- Fold the four per-feature params into f32 scale/shift ((F,)-sized).
    inv_std = lax.rsqrt(var.astype(jnp.float32) + eps)
    scale = weight.astype(jnp.float32) * inv_std
    shift = bias.astype(jnp.float32) - mean.astype(jnp.float32) * scale

    # ---- Tiny-input fast path: pallas_call overhead dwarfs the work.
    if not force_pallas and B * F * itemsize < _FAST_PATH_BYTES:
        y = x.astype(jnp.float32) * scale[None, :] + shift[None, :]
        return y.astype(x.dtype)

    # ---- Lane-dense packing: make the last dim a multiple of 128 when possible.
    # (Assumes x is contiguous row-major; otherwise XLA copies before the kernel.)
    pack = _choose_pack(B, F)
    if pack > 1:
        rows, Fe = B // pack, F * pack
        x_in = x.reshape(rows, Fe)
        scale_row = jnp.tile(scale, pack).reshape(1, Fe)
        shift_row = jnp.tile(shift, pack).reshape(1, Fe)
    else:
        rows, Fe = B, F
        x_in = x
        scale_row = scale.reshape(1, F)
        shift_row = shift.reshape(1, F)

    # ---- Generation-aware block sizing + optional feature-axis tiling.
    target_bytes, vmem_limit = _tpu_budgets()
    sub = _sublane_pack(x.dtype)
    tb, tf = _choose_tiles(rows, Fe, itemsize, sub, target_bytes)

    grid = (pl.cdiv(rows, tb), pl.cdiv(Fe, tf))
    x_spec = pl.BlockSpec((tb, tf), lambda i, j: (i, j))
    p_spec = pl.BlockSpec((1, tf), lambda i, j: (0, j))   # constant over rows

    cost = pl.CostEstimate(
        flops=2 * rows * Fe,
        transcendentals=0,
        bytes_accessed=2 * rows * Fe * itemsize + 2 * Fe * 4,
    )

    extra = {"input_output_aliases": {0: 0}} if donate_x else {}

    out = pl.pallas_call(
        _vbn_kernel,
        out_shape=jax.ShapeDtypeStruct((rows, Fe), x.dtype),
        grid_spec=pltpu.PrefetchScalarGridSpec(
            num_scalar_prefetch=0,
            grid=grid,
            in_specs=[x_spec, p_spec, p_spec],
            out_specs=x_spec,
        ),
        compiler_params=pltpu.CompilerParams(
            # Both axes write disjoint output blocks -> shardable across TCs.
            dimension_semantics=("parallel", "parallel"),
            vmem_limit_bytes=vmem_limit,
        ),
        cost_estimate=cost,
        **extra,
    )(x_in, scale_row, shift_row)

    return out.reshape(B, F) if pack > 1 else out


if __name__ == "__main__":
    root = jax.random.PRNGKey(0)

    def make_case(key, B, F, dtype):
        kx, km, kv, kw, kb = jax.random.split(key, 5)
        x = jax.random.normal(kx, (B, F), dtype=jnp.float32).astype(dtype)
        mean = jax.random.normal(km, (F,), dtype=jnp.float32) * 0.1
        var = jax.random.uniform(kv, (F,), dtype=jnp.float32, minval=0.5, maxval=1.5)
        weight = jax.random.uniform(kw, (F,), dtype=jnp.float32)
        bias = jax.random.normal(kb, (F,), dtype=jnp.float32) * 0.1
        return x, mean, var, weight, bias

    def ref_fn(x, mean, var, weight, bias):
        xf = x.astype(jnp.float32)
        return ((xf - mean[None, :]) / jnp.sqrt(var[None, :] + _EPS)
                * weight[None, :] + bias[None, :])

    # (name, (B, F), dtype, force_pallas, tol)
    cases = [
        ("f32  F=32  pack=4 -> lanes=128 (pallas)", (8, 32), jnp.float32, True, 1e-5),
        ("f32  F=48  pack=8 -> lanes=384 (pallas)", (64, 48), jnp.float32, True, 1e-5),
        ("bf16 F=192 pack=2 -> lanes=384 (pallas)", (32, 192), jnp.bfloat16, True, 5e-2),
        ("f32  tiny input fast path (plain jnp)", (8, 32), jnp.float32, False, 1e-5),
    ]
    keys = jax.random.split(root, len(cases))
    for key, (name, (B, F), dt, force, tol) in zip(keys, cases):
        x, mean, var, weight, bias = make_case(key, B, F, dt)
        out = virtual_batch_norm_1d(x, mean, var, weight, bias, force_pallas=force)
        out = jax.block_until_ready(out)
        assert out.shape == (B, F) and out.dtype == dt, name
        ref = ref_fn(x, mean, var, weight, bias)
        assert jnp.allclose(out.astype(jnp.float32), ref, atol=tol, rtol=tol), (
            "mismatch vs reference: " + name)

    print("KERNEL_OK")
</pallas_src>

<mosaic_0001>
module attributes {stable_mosaic.version = 11 : i64} {
  func.func @_vbn_kernel(%arg0: i32, %arg1: i32, %arg2: memref<2x128xf32, #tpu.memory_space<vmem>>, %arg3: memref<1x128xf32, #tpu.memory_space<vmem>>, %arg4: memref<1x128xf32, #tpu.memory_space<vmem>>, %arg5: memref<2x128xf32, #tpu.memory_space<vmem>>) attributes {dimension_semantics = [#tpu.dimension_semantics<parallel>, #tpu.dimension_semantics<parallel>], iteration_bounds = array<i64: 1, 1>, scalar_prefetch = 0 : i64, scratch_operands = 0 : i64, tpu.core_type = #tpu.core_type<tc>, window_params = [{transform_indices = @transform_0, window_bounds = array<i64: 2, 128>}, {transform_indices = @transform_1, window_bounds = array<i64: 1, 128>}, {transform_indices = @transform_2, window_bounds = array<i64: 1, 128>}, {transform_indices = @transform_3, window_bounds = array<i64: 2, 128>}]} {
    %c0 = arith.constant 0 : index
    %c0_0 = arith.constant 0 : index
    %0 = vector.load %arg2[%c0, %c0_0] : memref<2x128xf32, #tpu.memory_space<vmem>>, vector<2x128xf32>
    %c0_1 = arith.constant 0 : index
    %c0_2 = arith.constant 0 : index
    %1 = vector.load %arg3[%c0_1, %c0_2] : memref<1x128xf32, #tpu.memory_space<vmem>>, vector<1x128xf32>
    %2 = vector.broadcast %1 : vector<1x128xf32> to vector<2x128xf32>
    %3 = arith.mulf %0, %2 : vector<2x128xf32>
    %c0_3 = arith.constant 0 : index
    %c0_4 = arith.constant 0 : index
    %4 = vector.load %arg4[%c0_3, %c0_4] : memref<1x128xf32, #tpu.memory_space<vmem>>, vector<1x128xf32>
    %5 = vector.broadcast %4 : vector<1x128xf32> to vector<2x128xf32>
    %6 = arith.addf %3, %5 : vector<2x128xf32>
    %c0_5 = arith.constant 0 : index
    %c0_6 = arith.constant 0 : index
    %7 = vector.load %arg5[%c0_5, %c0_6] : memref<2x128xf32, #tpu.memory_space<vmem>>, vector<2x128xf32>
    tpu.vector_store %arg5[%c0_5, %c0_6], %6 {strides = array<i32>} : memref<2x128xf32, #tpu.memory_space<vmem>>, vector<2x128xf32>,
    return
  }
  func.func @transform_0(%arg0: i32, %arg1: i32) -> (i32, i32) {
    %c0_i32 = arith.constant 0 : i32
    return %arg0, %arg1 : i32, i32
  }
  func.func @transform_1(%arg0: i32, %arg1: i32) -> (i32, i32) {
    %c0_i32 = arith.constant 0 : i32
    %c0_i32_0 = arith.constant 0 : i32
    return %c0_i32, %arg1 : i32, i32
  }
  func.func @transform_2(%arg0: i32, %arg1: i32) -> (i32, i32) {
    %c0_i32 = arith.constant 0 : i32
    %c0_i32_0 = arith.constant 0 : i32
    return %c0_i32, %arg1 : i32, i32
  }
  func.func @transform_3(%arg0: i32, %arg1: i32) -> (i32, i32) {
    %c0_i32 = arith.constant 0 : i32
    return %arg0, %arg1 : i32, i32
  }
}

</mosaic_0001>

<bundles_post_ra>
// kernel: tpu_custom_call.1
= control target key start
LH: loop header
LB: loop body
LE: loop exit
PB: predicated region body
PF: predicated region fallthrough
CT: control target
= control target key end

     0   :  { %8 = vsyncpa [#allocation3], 0  ;;  %s142_s0 = inlined_call_operand.hbm [shape: f32[2,128], index: 0, kind: input, shape index: {}]   ;;  %s143_s1 = inlined_call_operand.vmem [shape: f32[1,128], index: 1, kind: input, shape index: {}]   ;;  %s144_s2 = inlined_call_operand.vmem [shape: f32[1,128], index: 2, kind: input, shape index: {}]   ;;  %s145_s3 = inlined_call_operand.hbm [shape: f32[2,128], index: 3, kind: output, shape index: {}]  }
   0x1   :  { %9 = vsyncpa [#allocation4], 0  ;;  %s108_s12 = smov [#allocation2]  }
   0x2   :  { %s16_s13 = sshll.u32 %s108_s12, 4  ;;  %s17_s13 = int_to_ptr.vmem [resolvable:$true] %s16_s13 }
   0x3   :  { %s72_s14 = scalar_lea.vmem %s17_s13, 32  ;;  %p77_p1 = scmp.lt.s32.totalorder %s17_s13, %s17_s13 }
   0x4   :  { %p73_p0 = scmp.ne.s32.totalorder %s17_s13, %s72_s14  ;;  %p78_p2 = scmp.lt.s32.totalorder %s72_s14, %s72_s14 }
   0x6   :  { %p79_p3 = por %p78_p2, %p77_p1 }
   0x8   :  { %p80_p4 = pnand %p79_p3, %p73_p0 }
   0xa   :  { %83 = shalt.err (!%p80_p4)
}
   0xb   :  { %19 = dma.hbm_to_vmem [thread:$0]  %s142_s0, 32, %s17_s13, [#allocation3]  }
   0xc   :  { %104 = dma.done.wait [#allocation3], 32  }
   0xd   :  { %105 = vsyncadd [#allocation3], 4294967264  ;;  %s109_s17 = smov [#allocation5]   ;;  %v27_v0 = vld [vmem:[#allocation2] sm:$0x3] }
   0xe   :  { %s51_s18 = sshll.u32 %s109_s17, 4  ;;  %v60_v1 = vld [vmem:[%s143_s1] ss:$0 sm:$0xff]  ;;  %s52_s18 = int_to_ptr.vmem [resolvable:$true] %s51_s18 }
   0xf   :  { %v61_v2 = vld [vmem:[%s144_s2] ss:$0 sm:$0xff]  ;;  %v35_v3 = vmul.f32 %v60_v1, %v27_v0  ;;  %s84_s23 = scalar_lea.vmem %s52_s18, 32  ;;  %p89_p6 = scmp.lt.s32.totalorder %s52_s18, %s52_s18 }
  0x10   :  { %p85_p5 = scmp.ne.s32.totalorder %s52_s18, %s84_s23  ;;  %p90_p7 = scmp.lt.s32.totalorder %s84_s23, %s84_s23 }
  0x11   :  { %v43_v4 = vadd.f32 %v61_v2, %v35_v3 }
  0x12   :  { %p91_p8 = por %p90_p7, %p89_p6 }
  0x13   :  { %44 = vst [vmem:[#allocation5] sm:$0x3] %v43_v4 }
  0x14   :  { %p92_p9 = pnand %p91_p8, %p85_p5 }
  0x16   :  { %95 = shalt.err (!%p92_p9)
}
  0x17   :  { %54 = dma.vmem_to_hbm [thread:$0]  %s52_s18, 32, %s145_s3, [#allocation4]  }
  0x18   :  { %106 = dma.done.wait [#allocation4], 32  }
  0x19   :  { %107 = vsyncadd [#allocation4], 4294967264 }
  0x1a   :  { %58 = vsyncpa [#allocation3], 1 }
  0x1b   :  { %59 = vsyncpa [#allocation4], 1 }

</bundles_post_ra>
